<compile_context>
chip_gen: v5e
topology: v5e:2x2
jax: 0.10.0
libtpu: 0.0.40
codegen_flags: <defaults>
</compile_context>

<pallas_src>
import functools

import numpy as np
import jax
import jax.numpy as jnp
from jax.experimental import pallas as pl
from jax.experimental.pallas import tpu as pltpu


def _round_up(n: int, m: int) -> int:
    return ((n + m - 1) // m) * m


def _cdiv(a: int, b: int) -> int:
    return (a + b - 1) // b


def _vmem_capacity_bytes() -> int:
    try:
        cap = int(pltpu.get_tpu_info().vmem_capacity_bytes)
        if cap > 0:
            return cap
    except Exception:
        pass
    return 64 * 1024 * 1024          # conservative (v7x-sized) fallback


def _sparsity_linear_kernel(x_ref, w_ref, b_ref, oh_ref, o_ref, y_acc, *, k_valid):
    """One (batch-tile, k-tile) grid step.

    x_ref : (tm, tk)        activation tile (ragged K tail masked in-kernel)
    w_ref : (tk, L_pad)     weight tile, compute dtype, K/L zero-padded
    b_ref : (1, L_pad) f32  bias (VMEM resident, constant index_map)
    oh_ref: (L_pad, OF)     one-hot scatter matrix (VMEM resident)
    o_ref : (tm, OF)        output tile (full out_features lane extent)
    y_acc : (tm, L_pad) f32 accumulator scratch
    """
    k = pl.program_id(1)

    @pl.when(k == 0)
    def _init():
        y_acc[...] = jnp.zeros_like(y_acc)

    x = x_ref[...]
    if k_valid is not None:                       # static: K % tk != 0
        tk = x_ref.shape[1]
        col = jax.lax.broadcasted_iota(jnp.int32, x_ref.shape, 1) + k * tk
        x = jnp.where(col < k_valid, x, 0)        # zero the undefined K tail

    y_acc[...] += jnp.dot(x.astype(w_ref.dtype), w_ref[...],
                          preferred_element_type=jnp.float32)

    @pl.when(k == pl.num_programs(1) - 1)
    def _finalize():
        y = (y_acc[...] + b_ref[...]).astype(oh_ref.dtype)
        # Column scatter as a small matmul against the resident one-hot
        # (one nonzero per kept column -> exact copy; other columns exactly 0).
        o_ref[...] = jnp.dot(y, oh_ref[...],
                             preferred_element_type=jnp.float32).astype(o_ref.dtype)


def sparsity_linear(x, w, b, lambda_to_keep, out_features, *,
                    block_b=512, block_k=2048,
                    compute_dtype=jnp.bfloat16, precise_scatter=False):
    """Pallas forward of SparsityLinear.

    x: (B, in_features); w: (in_features, num_lambda) (= torch weight.T);
    b: (num_lambda,); lambda_to_keep: num_lambda distinct ints < out_features.
    Returns (B, out_features) in x.dtype.
    """
    B, K = x.shape
    Kw, L = w.shape
    OF = int(out_features)
    assert Kw == K, "weight in_features mismatch"
    assert b.shape == (L,), "bias shape mismatch"
    out_dtype = x.dtype

    lam = jnp.asarray(lambda_to_keep, dtype=jnp.int32).reshape(-1)
    assert lam.shape[0] == L, "lambda_to_keep must have num_lambda entries"

    # Host-side validation (skipped if indices are traced).
    lam_host = None
    try:
        lam_host = np.asarray(jax.device_get(lam))
    except Exception:
        lam_host = None
    if lam_host is not None:
        if np.unique(lam_host).size != lam_host.size:
            raise ValueError("lambda_to_keep must hold distinct indices "
                             "(torch keeps the last write; the scatter matmul would sum).")
        if lam_host.size and (int(lam_host.min()) < 0 or int(lam_host.max()) >= OF):
            raise ValueError("lambda_to_keep indices out of range")

    # ---- operands in compute layout ----------------------------------------
    L_pad = _round_up(max(L, 1), 128)              # lane-dense accumulator
    oh_dtype = jnp.float32 if precise_scatter else compute_dtype

    w_c = w.astype(compute_dtype)
    bias = jnp.zeros((1, L_pad), jnp.float32).at[0, :L].set(b.astype(jnp.float32))
    lam_full = lam if L_pad == L else jnp.concatenate(
        [lam, jnp.full((L_pad - L,), -1, jnp.int32)])
    # One-hot scatter matrix built once; padded rows (-1) select nothing.
    onehot = (lam_full[:, None] ==
              jnp.arange(OF, dtype=jnp.int32)[None, :]).astype(oh_dtype)

    it_x = jnp.dtype(x.dtype).itemsize
    it_c = jnp.dtype(compute_dtype).itemsize
    it_oh = jnp.dtype(oh_dtype).itemsize
    it_o = jnp.dtype(out_dtype).itemsize

    # ---- tile selection ------------------------------------------------------
    if B < 16:
        tm = B                                     # full-dim block: always legal
    else:
        tm = min(block_b, _round_up(B, 8),
                 _round_up((B + 1) // 2, 8))       # >= 2 batch tiles (dual-TC v7x)
    tk = K if K <= block_k else block_k            # full-K block when it fits

    vmem_cap = _vmem_capacity_bytes()
    vmem_budget = int(vmem_cap * 0.75)

    def usage(tm_, tk_, out_bufs_):
        return (2 * tm_ * tk_ * it_x               # x tiles (double-buffered)
                + 2 * tk_ * L_pad * it_c           # w tiles (double-buffered)
                + out_bufs_ * tm_ * OF * it_o      # untiled-OF output block
                + tm_ * L_pad * 4                  # f32 accumulator scratch
                + 2 * L_pad * OF * it_oh           # resident one-hot
                + 2 * L_pad * 4                    # resident bias
                + (1 << 20))                       # headroom

    out_bufs = 2
    while usage(tm, tk, out_bufs) > vmem_budget:
        if out_bufs == 2:
            out_bufs = 1                 # output is written once per K sweep
        elif B >= 16 and tm > 8:
            tm = max(8, _round_up(tm // 2, 8))
        elif tk > 256 and tk % 256 == 0:
            tk //= 2
        else:
            break

    nb = _cdiv(B, tm)
    nk = _cdiv(K, tk)
    k_pad = nk * tk
    ragged_k = k_pad != K
    # w / bias are tiny: zero-pad them; never pad or copy the big x operand.
    if k_pad != K or L_pad != L:
        w_c = jnp.pad(w_c, ((0, k_pad - K), (0, L_pad - L)))

    vmem_limit = min(int(vmem_cap * 0.85),
                     max(32 * 1024 * 1024, int(usage(tm, tk, out_bufs) * 1.4)))

    cost = pl.CostEstimate(
        flops=2 * B * K * L + 2 * B * L_pad * OF,
        transcendentals=0,
        bytes_accessed=(B * K * it_x + k_pad * L_pad * it_c
                        + L_pad * OF * it_oh + L_pad * 4 + B * OF * it_o),
    )

    kernel = functools.partial(_sparsity_linear_kernel,
                               k_valid=K if ragged_k else None)

    if out_bufs == 1:
        out_spec = pl.BlockSpec((tm, OF), lambda i, k: (i, 0),
                                pipeline_mode=pl.Buffered(1))
    else:
        out_spec = pl.BlockSpec((tm, OF), lambda i, k: (i, 0))

    return pl.pallas_call(
        kernel,
        out_shape=jax.ShapeDtypeStruct((B, OF), out_dtype),
        grid_spec=pltpu.PrefetchScalarGridSpec(
            num_scalar_prefetch=0,
            grid=(nb, nk),
            in_specs=[
                pl.BlockSpec((tm, tk), lambda i, k: (i, k)),      # x tile
                pl.BlockSpec((tk, L_pad), lambda i, k: (k, 0)),   # w tile
                pl.BlockSpec((1, L_pad), lambda i, k: (0, 0)),    # bias (resident)
                pl.BlockSpec((L_pad, OF), lambda i, k: (0, 0)),   # one-hot (resident)
            ],
            out_specs=out_spec,
            scratch_shapes=[pltpu.VMEM((tm, L_pad), jnp.float32)],
        ),
        compiler_params=pltpu.CompilerParams(
            dimension_semantics=("parallel", "arbitrary"),
            vmem_limit_bytes=vmem_limit,
        ),
        cost_estimate=cost,
    )(x, w_c, bias, onehot)


# ---------------------------- references -------------------------------------
def reference_f32(x, w, b, lam, out_features):
    """Exact PyTorch semantics in f32."""
    y = x @ w + b
    out = jnp.zeros((x.shape[0], out_features), x.dtype)
    return out.at[:, lam].set(y.astype(x.dtype))


def reference_compute_dtype(x, w, b, lam, out_features, cdt):
    """Same math as the kernel (bf16 matmul inputs, f32 accum, bf16 scatter)."""
    y = jnp.dot(x.astype(cdt), w.astype(cdt),
                preferred_element_type=jnp.float32) + b.astype(jnp.float32)
    y = y.astype(cdt)                               # kernel casts y before scatter
    out = jnp.zeros((x.shape[0], out_features), x.dtype)
    return out.at[:, lam].set(y.astype(x.dtype))


if __name__ == "__main__":
    def run_case(key, batch, in_features, out_features, num_lambda, **kwargs):
        kx, kw, kb, kl = jax.random.split(key, 4)
        x = jax.random.normal(kx, (batch, in_features), jnp.float32)
        bound = 1.0 / (in_features ** 0.5)
        # nn.Linear weight is (num_lambda, in_features); we store its transpose.
        w = jax.random.uniform(kw, (in_features, num_lambda), jnp.float32,
                               minval=-bound, maxval=bound)
        b = jax.random.uniform(kb, (num_lambda,), jnp.float32,
                               minval=-bound, maxval=bound)
        lam = jax.random.permutation(kl, out_features)[:num_lambda].astype(jnp.int32)

        out = sparsity_linear(x, w, b, lam, out_features, **kwargs)
        out = jax.block_until_ready(out)
        assert out.shape == (batch, out_features), out.shape

        # Tight check vs a reference using the kernel's own compute dtypes.
        ref_c = reference_compute_dtype(x, w, b, lam, out_features, jnp.bfloat16)
        assert jnp.allclose(out, ref_c, atol=1e-2, rtol=1e-2), \
            "mismatch vs compute-dtype reference"

        # Loose check vs the exact f32 PyTorch-semantics reference.
        ref = reference_f32(x, w, b, lam, out_features)
        assert jnp.allclose(out, ref, atol=6e-2, rtol=6e-2), \
            "mismatch vs f32 reference"

        # Non-kept columns must be exactly zero.
        mask = jnp.ones((out_features,), bool).at[lam].set(False)
        assert bool(jnp.all(jnp.where(mask[None, :], out == 0.0, True))), \
            "non-kept columns not exactly zero"

    key = jax.random.PRNGKey(0)
    k1, k2 = jax.random.split(key)
    # Module-default-ish small config (single grid step).
    run_case(k1, batch=8, in_features=32, out_features=64, num_lambda=16)
    # Ragged everything: 2 batch tiles (24 with tm=16), 3 K tiles (640 = 2*256+128,
    # masked tail + zero-padded w), out_features not a multiple of 128, L padded.
    run_case(k2, batch=24, in_features=640, out_features=200, num_lambda=32,
             block_b=16, block_k=256)

    print("KERNEL_OK")
</pallas_src>

<mosaic_0001>
module attributes {stable_mosaic.version = 11 : i64} {
  func.func @_sparsity_linear_kernel(%arg0: i32, %arg1: i32, %arg2: memref<8x32xf32, #tpu.memory_space<vmem>>, %arg3: memref<32x128xbf16, #tpu.memory_space<vmem>>, %arg4: memref<1x128xf32, #tpu.memory_space<vmem>>, %arg5: memref<128x64xbf16, #tpu.memory_space<vmem>>, %arg6: memref<8x64xf32, #tpu.memory_space<vmem>>, %arg7: memref<8x128xf32, #tpu.memory_space<vmem>>) attributes {dimension_semantics = [#tpu.dimension_semantics<parallel>, #tpu.dimension_semantics<arbitrary>], iteration_bounds = array<i64: 1, 1>, scalar_prefetch = 0 : i64, scratch_operands = 1 : i64, tpu.core_type = #tpu.core_type<tc>, window_params = [{transform_indices = @transform_0, window_bounds = array<i64: 8, 32>}, {transform_indices = @transform_1, window_bounds = array<i64: 32, 128>}, {pipeline_mode = #tpu.pipeline_mode<synchronous>, transform_indices = @transform_2, window_bounds = array<i64: 1, 128>}, {pipeline_mode = #tpu.pipeline_mode<synchronous>, transform_indices = @transform_3, window_bounds = array<i64: 128, 64>}, {transform_indices = @transform_4, window_bounds = array<i64: 8, 64>}]} {
    %c0_i32 = arith.constant 0 : i32
    %0 = arith.cmpi eq, %arg1, %c0_i32 : i32
    %1 = arith.extui %0 : i1 to i32
    %c0_i32_0 = arith.constant 0 : i32
    %2 = arith.cmpi ne, %1, %c0_i32_0 : i32
    scf.if %2 {
      %cst_10 = arith.constant 0.000000e+00 : f32
      %13 = vector.broadcast %cst_10 : f32 to vector<8x128xf32>
      %c0_11 = arith.constant 0 : index
      %c0_12 = arith.constant 0 : index
      %14 = vector.load %arg7[%c0_11, %c0_12] : memref<8x128xf32, #tpu.memory_space<vmem>>, vector<8x128xf32>
      tpu.vector_store %arg7[%c0_11, %c0_12], %13 {strides = array<i32>} : memref<8x128xf32, #tpu.memory_space<vmem>>, vector<8x128xf32>,
    } else {
    }
    %c0 = arith.constant 0 : index
    %c0_1 = arith.constant 0 : index
    %3 = vector.load %arg2[%c0, %c0_1] : memref<8x32xf32, #tpu.memory_space<vmem>>, vector<8x32xf32>
    %c0_2 = arith.constant 0 : index
    %c0_3 = arith.constant 0 : index
    %4 = vector.load %arg7[%c0_2, %c0_3] : memref<8x128xf32, #tpu.memory_space<vmem>>, vector<8x128xf32>
    %5 = arith.truncf %3 : vector<8x32xf32> to vector<8x32xbf16>
    %c0_4 = arith.constant 0 : index
    %c0_5 = arith.constant 0 : index
    %6 = vector.load %arg3[%c0_4, %c0_5] : memref<32x128xbf16, #tpu.memory_space<vmem>>, vector<32x128xbf16>
    %cst = arith.constant dense<0.000000e+00> : vector<8x128xf32>
    %7 = tpu.matmul %5, %6, %cst {dimension_numbers = #tpu.dot_dimension_numbers<[1], [0], [0], [1], [0, 0, 1, 1], [], []>} : vector<8x32xbf16>, vector<32x128xbf16>, vector<8x128xf32> -> vector<8x128xf32>
    %8 = arith.addf %4, %7 : vector<8x128xf32>
    %c0_6 = arith.constant 0 : index
    %c0_7 = arith.constant 0 : index
    %9 = vector.load %arg7[%c0_6, %c0_7] : memref<8x128xf32, #tpu.memory_space<vmem>>, vector<8x128xf32>
    tpu.vector_store %arg7[%c0_6, %c0_7], %8 {strides = array<i32>} : memref<8x128xf32, #tpu.memory_space<vmem>>, vector<8x128xf32>,
    %c0_i32_8 = arith.constant 0 : i32
    %10 = arith.cmpi eq, %arg1, %c0_i32_8 : i32
    %11 = arith.extui %10 : i1 to i32
    %c0_i32_9 = arith.constant 0 : i32
    %12 = arith.cmpi ne, %11, %c0_i32_9 : i32
    scf.if %12 {
      %c0_10 = arith.constant 0 : index
      %c0_11 = arith.constant 0 : index
      %13 = vector.load %arg7[%c0_10, %c0_11] : memref<8x128xf32, #tpu.memory_space<vmem>>, vector<8x128xf32>
      %c0_12 = arith.constant 0 : index
      %c0_13 = arith.constant 0 : index
      %14 = vector.load %arg4[%c0_12, %c0_13] : memref<1x128xf32, #tpu.memory_space<vmem>>, vector<1x128xf32>
      %15 = vector.broadcast %14 : vector<1x128xf32> to vector<8x128xf32>
      %16 = arith.addf %13, %15 : vector<8x128xf32>
      %17 = arith.truncf %16 : vector<8x128xf32> to vector<8x128xbf16>
      %c0_14 = arith.constant 0 : index
      %c0_15 = arith.constant 0 : index
      %18 = vector.load %arg5[%c0_14, %c0_15] : memref<128x64xbf16, #tpu.memory_space<vmem>>, vector<128x64xbf16>
      %cst_16 = arith.constant dense<0.000000e+00> : vector<8x64xf32>
      %19 = tpu.matmul %17, %18, %cst_16 {dimension_numbers = #tpu.dot_dimension_numbers<[1], [0], [0], [1], [0, 0, 1, 1], [], []>} : vector<8x128xbf16>, vector<128x64xbf16>, vector<8x64xf32> -> vector<8x64xf32>
      %c0_17 = arith.constant 0 : index
      %c0_18 = arith.constant 0 : index
      %20 = vector.load %arg6[%c0_17, %c0_18] : memref<8x64xf32, #tpu.memory_space<vmem>>, vector<8x64xf32>
      tpu.vector_store %arg6[%c0_17, %c0_18], %19 {strides = array<i32>} : memref<8x64xf32, #tpu.memory_space<vmem>>, vector<8x64xf32>,
    } else {
    }
    return
  }
  func.func @transform_0(%arg0: i32, %arg1: i32) -> (i32, i32) {
    %c0_i32 = arith.constant 0 : i32
    return %arg0, %arg1 : i32, i32
  }
  func.func @transform_1(%arg0: i32, %arg1: i32) -> (i32, i32) {
    %c0_i32 = arith.constant 0 : i32
    %c0_i32_0 = arith.constant 0 : i32
    return %arg1, %c0_i32 : i32, i32
  }
  func.func @transform_2(%arg0: i32, %arg1: i32) -> (i32, i32) {
    %c0_i32 = arith.constant 0 : i32
    %c0_i32_0 = arith.constant 0 : i32
    %c0_i32_1 = arith.constant 0 : i32
    return %c0_i32, %c0_i32_0 : i32, i32
  }
  func.func @transform_3(%arg0: i32, %arg1: i32) -> (i32, i32) {
    %c0_i32 = arith.constant 0 : i32
    %c0_i32_0 = arith.constant 0 : i32
    %c0_i32_1 = arith.constant 0 : i32
    return %c0_i32, %c0_i32_0 : i32, i32
  }
  func.func @transform_4(%arg0: i32, %arg1: i32) -> (i32, i32) {
    %c0_i32 = arith.constant 0 : i32
    %c0_i32_0 = arith.constant 0 : i32
    return %arg0, %c0_i32 : i32, i32
  }
}

</mosaic_0001>

<bundles_post_ra>
// kernel: tpu_custom_call.1
= control target key start
LH: loop header
LB: loop body
LE: loop exit
PB: predicated region body
PF: predicated region fallthrough
CT: control target
= control target key end

     0   :  { %s311_s0 = inlined_call_operand.vmem [shape: f32[8,32], index: 0, kind: input, shape index: {}]   ;;  %s312_s1 = inlined_call_operand.vmem [shape: bf16[32,128], index: 1, kind: input, shape index: {}]   ;;  %s313_s2 = inlined_call_operand.vmem [shape: f32[1,128], index: 2, kind: input, shape index: {}]   ;;  %s314_s3 = inlined_call_operand.vmem [shape: bf16[128,64], index: 3, kind: input, shape index: {}]   ;;  %s315_s4 = inlined_call_operand.hbm [shape: f32[8,64], index: 4, kind: output, shape index: {}]  }
   0x1   :  { %v209_v0 = vld [vmem:[%s312_s1 + $0x8] sm:$0xff]  ;;  %v217_v1 = vld [vmem:[%s314_s3 + $0x38] sm:$0xff]  ;;  %v208_v2 = vld [vmem:[%s312_s1] sm:$0xff] }
   0x2   :  { %53 = vmatpush.bf16.msra.mxu0 %v209_v0  ;;  %v24_v3 = vld [vmem:[%s311_s0] sm:$0xff]  ;;  %136 = vmatpush.bf16.msra.mxu1 %v217_v1  ;;  %v216_v4 = vld [vmem:[%s314_s3 + $0x30] sm:$0xff] }
   0x3   :  { %9 = vsyncpa [#allocation4], 0  ;;  %v26_v5 = vpack.c.bf16 %v24_v3, %v24_v3  ;;  %vm43_vm0 = vcmask 261120   ;;  %v215_v6 = vld [vmem:[%s314_s3 + $0x28] sm:$0xff]  ;;  %v214_v7 = vld [vmem:[%s314_s3 + $0x20] sm:$0xff]  ;;  %s246_s11 = smov [#allocation3]  }
   0x4   :  { %v213_v8 = vld [vmem:[%s314_s3 + $0x18] sm:$0xff]  ;;  %v212_v9 = vld [vmem:[%s314_s3 + $0x10] sm:$0xff]  ;;  %v211_v10 = vld [vmem:[%s314_s3 + $0x8] sm:$0xff]  ;;  %s156_s12 = sshll.u32 %s246_s11, 4  ;;  %s158_s15 = sshll.u32 %s315_s4, 4  ;;  %vm149_vm1 = vcmask 523264   ;;  %s157_s12 = int_to_ptr.vmem [resolvable:$true] %s156_s12  ;;  %s159_s15 = int_to_ptr.hbm [resolvable:$true] %s158_s15 }
   0x5   :  { %v210_v11 = vld [vmem:[%s314_s3] sm:$0xff] }
   0x6   :  { %54 = vmatpush.bf16.msra.mxu0 %v208_v2  ;;  %137 = vmatpush.bf16.msra.mxu1 %v216_v4  ;;  %v219_v12 = vld [vmem:[%s313_s2] ss:$0 sm:$0xff] }
   0x9   :  { %175 = vmatmul.msk.bf16.vlgmr.msra.gmra.mxu0 %vm43_vm0, %v26_v5 }
   0xa   :  { %138 = vmatpush.bf16.msra.mxu1 %v215_v6 }
   0xe   :  { %139 = vmatpush.bf16.msra.mxu1 %v214_v7 }
  0x12   :  { %140 = vmatpush.bf16.msra.mxu1 %v213_v8 }
  0x16   :  { %141 = vmatpush.bf16.msra.mxu1 %v212_v9 }
  0x1a   :  { %142 = vmatpush.bf16.msra.mxu1 %v211_v10 }
  0x1e   :  { %143 = vmatpush.bf16.msra.mxu1 %v210_v11 }
  0x86   :  { %v56_v13 = vpop.f32.mrf.mxu0 }
  0x87   :  { %v70_v14 = vadd.f32 %v219_v12, %v56_v13 }
  0x89   :  { %v71_v15 = vpack.c.bf16 %v70_v14, %v70_v14 }
  0x8b   :  { %144 = vmatmul.bf16.vlgmr.msra.gmra.mxu1 %v71_v15 }
  0x8e   :  { %v58_v16 = vpop.f32.mrf.mxu0 }
 0x108   :  { %v145_v17 = vpop.f32.mrf.mxu1 }
 0x109   :  { %150 = vst.msk [vmem:[#allocation3] sm:$0xff] %vm149_vm1, %v145_v17 }
 0x10a   :  { %161 = dma.vmem_to_hbm [thread:$0]  %s157_s12, 128, %s159_s15, [#allocation4]  }
 0x110   :  { %v147_v18 = vpop.f32.mrf.mxu1 }
 0x111   :  { %244 = dma.done.wait [#allocation4], 128  }
 0x112   :  { %245 = vsyncadd [#allocation4], 4294967168 }
 0x113   :  { %166 = vsyncpa [#allocation4], 1 }

</bundles_post_ra>
